<compile_context>
chip_gen: v6e
topology: v6e:2x2x1
jax: 0.10.0
libtpu: 0.0.40
codegen_flags: <defaults>
</compile_context>

<pallas_src>
import jax
import jax.numpy as jnp
from jax.experimental import pallas as pl
from jax.experimental.pallas import tpu as pltpu


def _round_up(x, m):
    return ((x + m - 1) // m) * m


def _choose_batch_tile(batch, max_tile=2048):
    """Batch tile: as large as useful, multiple of 16, >=2 grid steps when possible."""
    rb = _round_up(batch, 16)
    if rb >= 32:
        # Keep at least 2 grid steps so v7x's two TensorCores both get work.
        tb = min(max_tile, _round_up(pl.cdiv(rb, 2), 16))
    else:
        tb = rb
    return tb


def mlp_kernel(x_ref, w1_ref, b1_ref, w2_ref, b2_ref, w3_ref, b3_ref, out_ref):
    a = out_ref.shape[-1]  # true action_size (output is stored unpadded)

    # fc1 + relu: K=8 so the MXU is tiny-utilized regardless of dtype -> keep f32
    # inputs here (zero-cost accuracy), accumulate in f32.
    h1 = jnp.dot(x_ref[...], w1_ref[...], preferred_element_type=jnp.float32)
    h1 = jnp.maximum(h1 + b1_ref[...], 0.0)

    # fc2 + relu: bf16 MXU inputs, f32 accumulation / epilogue.
    h2 = jnp.dot(h1.astype(jnp.bfloat16), w2_ref[...],
                 preferred_element_type=jnp.float32)
    h2 = jnp.maximum(h2 + b2_ref[...], 0.0)

    # fc3 (Q-values): w3 is lane-padded to 128 for the matmul; store only the
    # valid action lanes (masked vst, but ~32x fewer HBM bytes for A=4).
    q = jnp.dot(h2.astype(jnp.bfloat16), w3_ref[...],
                preferred_element_type=jnp.float32)
    out_ref[...] = q[:, :a] + b3_ref[...]


def prepare_params(params):
    """One-time parameter preparation (casts / padding), hoisted out of the forward path.

    params: w1 (S,128), b1 (1,128), w2 (128,256), b2 (1,256), w3 (256,A), b3 (1,A),
            all float32, (in_features, out_features) layout so the kernel computes
            x @ W + b (== PyTorch x @ W_pt.T + b).
    """
    action_size = params["w3"].shape[1]
    ap = _round_up(max(action_size, 128), 128)
    w3 = params["w3"]
    if ap != action_size:
        w3 = jnp.pad(w3, ((0, 0), (0, ap - action_size)))
    return {
        "w1": params["w1"].astype(jnp.float32),   # first matmul stays f32 (K=8)
        "b1": params["b1"].astype(jnp.float32),
        "w2": params["w2"].astype(jnp.bfloat16),
        "b2": params["b2"].astype(jnp.float32),
        "w3": w3.astype(jnp.bfloat16),            # (256, 128) lane-padded
        "b3": params["b3"].astype(jnp.float32),   # (1, A) unpadded
    }


def mlp_forward(x, prepared, *, max_batch_tile=2048):
    """Fused MLP forward on TPU via Pallas.

    x: (batch, state_size) float32
    prepared: output of prepare_params().
    Returns (batch, action_size) float32 Q-values.
    """
    batch, state_size = x.shape
    h1_dim = prepared["w1"].shape[1]     # 128
    h2_dim = prepared["w2"].shape[1]     # 256
    ap = prepared["w3"].shape[1]         # 128 (lane-padded)
    action_size = prepared["b3"].shape[1]

    tb = _choose_batch_tile(batch, max_batch_tile)
    grid = (pl.cdiv(batch, tb),)

    # x / out stream through the pipeline (double-buffered); weights & biases use
    # constant index_maps so they are DMA'd once and stay resident in VMEM.
    x_spec = pl.BlockSpec((tb, state_size), lambda i: (i, 0))
    w1_spec = pl.BlockSpec((state_size, h1_dim), lambda i: (0, 0))
    b1_spec = pl.BlockSpec((1, h1_dim), lambda i: (0, 0))
    w2_spec = pl.BlockSpec((h1_dim, h2_dim), lambda i: (0, 0))
    b2_spec = pl.BlockSpec((1, h2_dim), lambda i: (0, 0))
    w3_spec = pl.BlockSpec((h2_dim, ap), lambda i: (0, 0))
    b3_spec = pl.BlockSpec((1, action_size), lambda i: (0, 0))
    out_spec = pl.BlockSpec((tb, action_size), lambda i: (i, 0))

    return pl.pallas_call(
        mlp_kernel,
        out_shape=jax.ShapeDtypeStruct((batch, action_size), jnp.float32),
        grid_spec=pltpu.PrefetchScalarGridSpec(
            num_scalar_prefetch=0,
            grid=grid,
            in_specs=[x_spec, w1_spec, b1_spec, w2_spec, b2_spec,
                      w3_spec, b3_spec],
            out_specs=out_spec,
        ),
        compiler_params=pltpu.CompilerParams(
            dimension_semantics=("parallel",),
        ),
    )(x, prepared["w1"], prepared["b1"], prepared["w2"], prepared["b2"],
      prepared["w3"], prepared["b3"])


def init_params(key, state_size, action_size):
    """Deterministic synthetic parameter init (uniform, PyTorch-Linear-like bounds)."""
    ks = jax.random.split(key, 6)

    def uniform(k, shape, fan_in):
        bound = 1.0 / jnp.sqrt(float(fan_in))
        return jax.random.uniform(k, shape, jnp.float32, -bound, bound)

    return {
        "w1": uniform(ks[0], (state_size, 128), state_size),
        "b1": uniform(ks[1], (1, 128), state_size),
        "w2": uniform(ks[2], (128, 256), 128),
        "b2": uniform(ks[3], (1, 256), 128),
        "w3": uniform(ks[4], (256, action_size), 256),
        "b3": uniform(ks[5], (1, action_size), 256),
    }


def reference_forward(x, params):
    # Pure f32 JAX reference (PyTorch semantics).
    h1 = jnp.maximum(x @ params["w1"] + params["b1"], 0.0)
    h2 = jnp.maximum(h1 @ params["w2"] + params["b2"], 0.0)
    return h2 @ params["w3"] + params["b3"]


if __name__ == "__main__":
    state_size = 8     # small DQN state vector
    action_size = 4    # small discrete action space

    key = jax.random.PRNGKey(0)
    k_p, k1, k2, k3 = jax.random.split(key, 4)
    params = init_params(k_p, state_size, action_size)
    prepared = prepare_params(params)

    # batch=2  : single (ragged) block, block > batch
    # batch=500: 2 grid steps, ragged last block (masked output writeback)
    # batch=512: 2 exact grid steps (parallel axis exercised)
    for batch, kx in ((2, k1), (500, k2), (512, k3)):
        x = jax.random.normal(kx, (batch, state_size), dtype=jnp.float32)
        q = jax.block_until_ready(mlp_forward(x, prepared))
        q_ref = reference_forward(x, params)
        assert q.shape == (batch, action_size)
        # bf16 activations/weights in layers 2-3 with f32 accumulation -> relaxed tol.
        assert jnp.allclose(q, q_ref, atol=3e-2, rtol=3e-2), f"mismatch at batch={batch}"

    print("KERNEL_OK")
</pallas_src>

<mosaic_0001>
module attributes {stable_mosaic.version = 11 : i64} {
  func.func @mlp_kernel(%arg0: i32, %arg1: memref<16x8xf32, #tpu.memory_space<vmem>>, %arg2: memref<8x128xf32, #tpu.memory_space<vmem>>, %arg3: memref<1x128xf32, #tpu.memory_space<vmem>>, %arg4: memref<128x256xbf16, #tpu.memory_space<vmem>>, %arg5: memref<1x256xf32, #tpu.memory_space<vmem>>, %arg6: memref<256x128xbf16, #tpu.memory_space<vmem>>, %arg7: memref<1x4xf32, #tpu.memory_space<vmem>>, %arg8: memref<16x4xf32, #tpu.memory_space<vmem>>) attributes {dimension_semantics = [#tpu.dimension_semantics<parallel>], iteration_bounds = array<i64: 1>, scalar_prefetch = 0 : i64, scratch_operands = 0 : i64, tpu.core_type = #tpu.core_type<tc>, window_params = [{transform_indices = @transform_0, window_bounds = array<i64: 16, 8>}, {pipeline_mode = #tpu.pipeline_mode<synchronous>, transform_indices = @transform_1, window_bounds = array<i64: 8, 128>}, {pipeline_mode = #tpu.pipeline_mode<synchronous>, transform_indices = @transform_2, window_bounds = array<i64: 1, 128>}, {pipeline_mode = #tpu.pipeline_mode<synchronous>, transform_indices = @transform_3, window_bounds = array<i64: 128, 256>}, {pipeline_mode = #tpu.pipeline_mode<synchronous>, transform_indices = @transform_4, window_bounds = array<i64: 1, 256>}, {pipeline_mode = #tpu.pipeline_mode<synchronous>, transform_indices = @transform_5, window_bounds = array<i64: 256, 128>}, {pipeline_mode = #tpu.pipeline_mode<synchronous>, transform_indices = @transform_6, window_bounds = array<i64: 1, 4>}, {transform_indices = @transform_7, window_bounds = array<i64: 16, 4>}]} {
    %c0 = arith.constant 0 : index
    %c0_0 = arith.constant 0 : index
    %0 = vector.load %arg1[%c0, %c0_0] : memref<16x8xf32, #tpu.memory_space<vmem>>, vector<16x8xf32>
    %c0_1 = arith.constant 0 : index
    %c0_2 = arith.constant 0 : index
    %1 = vector.load %arg2[%c0_1, %c0_2] : memref<8x128xf32, #tpu.memory_space<vmem>>, vector<8x128xf32>
    %cst = arith.constant dense<0.000000e+00> : vector<16x128xf32>
    %2 = tpu.matmul %0, %1, %cst {dimension_numbers = #tpu.dot_dimension_numbers<[1], [0], [0], [1], [0, 0, 1, 1], [], []>} : vector<16x8xf32>, vector<8x128xf32>, vector<16x128xf32> -> vector<16x128xf32>
    %c0_3 = arith.constant 0 : index
    %c0_4 = arith.constant 0 : index
    %3 = vector.load %arg3[%c0_3, %c0_4] : memref<1x128xf32, #tpu.memory_space<vmem>>, vector<1x128xf32>
    %4 = vector.broadcast %3 : vector<1x128xf32> to vector<16x128xf32>
    %5 = arith.addf %2, %4 : vector<16x128xf32>
    %cst_5 = arith.constant 0.000000e+00 : f32
    %6 = vector.broadcast %cst_5 : f32 to vector<16x128xf32>
    %7 = arith.maximumf %5, %6 : vector<16x128xf32>
    %8 = arith.truncf %7 : vector<16x128xf32> to vector<16x128xbf16>
    %c0_6 = arith.constant 0 : index
    %c0_7 = arith.constant 0 : index
    %9 = vector.load %arg4[%c0_6, %c0_7] : memref<128x256xbf16, #tpu.memory_space<vmem>>, vector<128x256xbf16>
    %cst_8 = arith.constant dense<0.000000e+00> : vector<16x256xf32>
    %10 = tpu.matmul %8, %9, %cst_8 {dimension_numbers = #tpu.dot_dimension_numbers<[1], [0], [0], [1], [0, 0, 1, 1], [], []>} : vector<16x128xbf16>, vector<128x256xbf16>, vector<16x256xf32> -> vector<16x256xf32>
    %c0_9 = arith.constant 0 : index
    %c0_10 = arith.constant 0 : index
    %11 = vector.load %arg5[%c0_9, %c0_10] : memref<1x256xf32, #tpu.memory_space<vmem>>, vector<1x256xf32>
    %12 = vector.broadcast %11 : vector<1x256xf32> to vector<16x256xf32>
    %13 = arith.addf %10, %12 : vector<16x256xf32>
    %cst_11 = arith.constant 0.000000e+00 : f32
    %14 = vector.broadcast %cst_11 : f32 to vector<16x256xf32>
    %15 = arith.maximumf %13, %14 : vector<16x256xf32>
    %16 = arith.truncf %15 : vector<16x256xf32> to vector<16x256xbf16>
    %c0_12 = arith.constant 0 : index
    %c0_13 = arith.constant 0 : index
    %17 = vector.load %arg6[%c0_12, %c0_13] : memref<256x128xbf16, #tpu.memory_space<vmem>>, vector<256x128xbf16>
    %cst_14 = arith.constant dense<0.000000e+00> : vector<16x128xf32>
    %18 = tpu.matmul %16, %17, %cst_14 {dimension_numbers = #tpu.dot_dimension_numbers<[1], [0], [0], [1], [0, 0, 1, 1], [], []>} : vector<16x256xbf16>, vector<256x128xbf16>, vector<16x128xf32> -> vector<16x128xf32>
    %19 = vector.extract_strided_slice %18 {offsets = [0, 0], sizes = [16, 4], strides = [1, 1]} : vector<16x128xf32> to vector<16x4xf32>
    %c0_15 = arith.constant 0 : index
    %c0_16 = arith.constant 0 : index
    %20 = vector.load %arg7[%c0_15, %c0_16] : memref<1x4xf32, #tpu.memory_space<vmem>>, vector<1x4xf32>
    %21 = vector.broadcast %20 : vector<1x4xf32> to vector<16x4xf32>
    %22 = arith.addf %19, %21 : vector<16x4xf32>
    %c0_17 = arith.constant 0 : index
    %c0_18 = arith.constant 0 : index
    %23 = vector.load %arg8[%c0_17, %c0_18] : memref<16x4xf32, #tpu.memory_space<vmem>>, vector<16x4xf32>
    tpu.vector_store %arg8[%c0_17, %c0_18], %22 {strides = array<i32>} : memref<16x4xf32, #tpu.memory_space<vmem>>, vector<16x4xf32>,
    return
  }
  func.func @transform_0(%arg0: i32) -> (i32, i32) {
    %c0_i32 = arith.constant 0 : i32
    %c0_i32_0 = arith.constant 0 : i32
    return %arg0, %c0_i32 : i32, i32
  }
  func.func @transform_1(%arg0: i32) -> (i32, i32) {
    %c0_i32 = arith.constant 0 : i32
    %c0_i32_0 = arith.constant 0 : i32
    %c0_i32_1 = arith.constant 0 : i32
    return %c0_i32, %c0_i32_0 : i32, i32
  }
  func.func @transform_2(%arg0: i32) -> (i32, i32) {
    %c0_i32 = arith.constant 0 : i32
    %c0_i32_0 = arith.constant 0 : i32
    %c0_i32_1 = arith.constant 0 : i32
    return %c0_i32, %c0_i32_0 : i32, i32
  }
  func.func @transform_3(%arg0: i32) -> (i32, i32) {
    %c0_i32 = arith.constant 0 : i32
    %c0_i32_0 = arith.constant 0 : i32
    %c0_i32_1 = arith.constant 0 : i32
    return %c0_i32, %c0_i32_0 : i32, i32
  }
  func.func @transform_4(%arg0: i32) -> (i32, i32) {
    %c0_i32 = arith.constant 0 : i32
    %c0_i32_0 = arith.constant 0 : i32
    %c0_i32_1 = arith.constant 0 : i32
    return %c0_i32, %c0_i32_0 : i32, i32
  }
  func.func @transform_5(%arg0: i32) -> (i32, i32) {
    %c0_i32 = arith.constant 0 : i32
    %c0_i32_0 = arith.constant 0 : i32
    %c0_i32_1 = arith.constant 0 : i32
    return %c0_i32, %c0_i32_0 : i32, i32
  }
  func.func @transform_6(%arg0: i32) -> (i32, i32) {
    %c0_i32 = arith.constant 0 : i32
    %c0_i32_0 = arith.constant 0 : i32
    %c0_i32_1 = arith.constant 0 : i32
    return %c0_i32, %c0_i32_0 : i32, i32
  }
  func.func @transform_7(%arg0: i32) -> (i32, i32) {
    %c0_i32 = arith.constant 0 : i32
    %c0_i32_0 = arith.constant 0 : i32
    return %arg0, %c0_i32 : i32, i32
  }
}

</mosaic_0001>

<bundles_post_ra>
// kernel: tpu_custom_call.1
= control target key start
LH: loop header
LB: loop body
LE: loop exit
PB: predicated region body
PF: predicated region fallthrough
CT: control target
= control target key end

     0   :  { %12 = vsyncpa [#allocation3], 0  ;;  %s841_s0 = inlined_call_operand.hbm [shape: f32[2,8], index: 0, kind: input, shape index: {}]   ;;  %s842_s1 = inlined_call_operand.hbm [shape: f32[8,128], index: 1, kind: input, shape index: {}]   ;;  %s843_s2 = inlined_call_operand.vmem [shape: f32[1,128], index: 2, kind: input, shape index: {}]   ;;  %s844_s3 = inlined_call_operand.hbm [shape: bf16[128,256], index: 3, kind: input, shape index: {}]   ;;  %s845_s4 = inlined_call_operand.vmem [shape: f32[1,256], index: 4, kind: input, shape index: {}]   ;;  %s846_s5 = inlined_call_operand.hbm [shape: bf16[256,128], index: 5, kind: input, shape index: {}]   ;;  %s847_s6 = inlined_call_operand.vmem [shape: f32[1,4], index: 6, kind: input, shape index: {}]   ;;  %s848_s7 = inlined_call_operand.hbm [shape: f32[2,4], index: 7, kind: output, shape index: {}]  }
   0x1   :  { %13 = vsyncpa [#allocation6], 0 }
   0x2   :  { %14 = vsyncpa [#allocation9], 0 }
   0x3   :  { %15 = vsyncpa [#allocation4], 0 }
   0x4   :  { %20 = vsyncadd [#allocation3], 224  ;;  %s759_s24 = smov [#allocation5]   ;;  %s760_s26 = smov [#allocation2]  }
   0x5   :  { %s34_s25 = sshll.u32 %s759_s24, 4  ;;  %s21_s27 = sshll.u32 %s760_s26, 4  ;;  %s35_s25 = int_to_ptr.vmem [resolvable:$true] %s34_s25  ;;  %s22_s27 = int_to_ptr.vmem [resolvable:$true] %s21_s27 }
   0x6   :  { %s659_s28 = scalar_lea.vmem %s35_s25, 128  ;;  %p664_p1 = scmp.lt.s32.totalorder %s35_s25, %s35_s25 }
   0x7   :  { %p660_p0 = scmp.ne.s32.totalorder %s35_s25, %s659_s28  ;;  %p665_p2 = scmp.lt.s32.totalorder %s659_s28, %s659_s28 }
   0x9   :  { %p666_p3 = por %p665_p2, %p664_p1 }
   0xb   :  { %p667_p4 = pnand %p666_p3, %p660_p0 }
   0xd   :  { %670 = shalt.err (!%p667_p4)
}
   0xe   :  { %37 = dma.hbm_to_vmem [thread:$0]  %s842_s1, 128, %s35_s25, [#allocation6]  }
   0xf   :  { %s679_s8 = scalar_lea.vmem %s22_s27, 32  ;;  %s683_s9 = scalar_lea.vmem %s22_s27, 256 }
  0x10   :  { %p680_p5 = scmp.ne.s32.totalorder %s22_s27, %s679_s8  ;;  %p684_p6 = scmp.lt.s32.totalorder %s22_s27, %s22_s27 }
  0x11   :  { %p685_p7 = scmp.lt.s32.totalorder %s683_s9, %s679_s8 }
  0x13   :  { %p686_p8 = por %p685_p7, %p684_p6 }
  0x15   :  { %p687_p9 = pnand %p686_p8, %p680_p5 }
  0x17   :  { %690 = shalt.err (!%p687_p9)
}
  0x18   :  { %s761_s10 = smov 32   ;;  %s762_s11 = smov 2  }
  0x19   :  { %27 = dma.hbm_to_vmem [thread:$0]  %s841_s0, 32, %s22_s27, [#allocation3], %s761_s10, %s761_s10, %s762_s11  }
  0x1a   :  { %s763_s14 = smov [#allocation7]  }
  0x1b   :  { %s45_s15 = sshll.u32 %s763_s14, 4  ;;  %s46_s15 = int_to_ptr.vmem [resolvable:$true] %s45_s15 }
  0x1c   :  { %s699_s1 = scalar_lea.vmem %s46_s15, 2048  ;;  %p704_p11 = scmp.lt.s32.totalorder %s46_s15, %s46_s15 }
  0x1d   :  { %p700_p10 = scmp.ne.s32.totalorder %s46_s15, %s699_s1  ;;  %p705_p12 = scmp.lt.s32.totalorder %s699_s1, %s699_s1 }
  0x1f   :  { %p706_p13 = por %p705_p12, %p704_p11 }
  0x21   :  { %p707_p0 = pnand %p706_p13, %p700_p10 }
  0x23   :  { %710 = shalt.err (!%p707_p0)
}
  0x24   :  { %s764_s16 = smov 128   ;;  %s765_s17 = smov 8  }
  0x25   :  { %51 = dma.hbm_to_vmem [thread:$0]  %s844_s3, 2048, %s46_s15, [#allocation6], %s764_s16, %s764_s16, %s765_s17  }
  0x26   :  { %s766_s20 = smov [#allocation8]  }
  0x27   :  { %s59_s21 = sshll.u32 %s766_s20, 4  ;;  %s60_s21 = int_to_ptr.vmem [resolvable:$true] %s59_s21 }
  0x28   :  { %s719_s0 = scalar_lea.vmem %s60_s21, 2048  ;;  %p724_p2 = scmp.lt.s32.totalorder %s60_s21, %s60_s21 }
  0x29   :  { %p720_p1 = scmp.ne.s32.totalorder %s60_s21, %s719_s0  ;;  %p725_p3 = scmp.lt.s32.totalorder %s719_s0, %s719_s0 }
  0x2b   :  { %p726_p4 = por %p725_p3, %p724_p2 }
  0x2d   :  { %p727_p5 = pnand %p726_p4, %p720_p1 }
  0x2f   :  { %730 = shalt.err (!%p727_p5)
}
  0x30   :  { %s767_s22 = smov 64   ;;  %s768_s23 = smov 4  }
  0x31   :  { %65 = dma.hbm_to_vmem [thread:$0]  %s846_s5, 2048, %s60_s21, [#allocation9], %s767_s22, %s767_s22, %s768_s23  }
  0x32   :  { %751 = dma.done.wait [#allocation3], 256  }
  0x33   :  { %752 = vsyncadd [#allocation3], 4294967040 }
  0x34   :  { %753 = dma.done.wait [#allocation6], 2176  }
  0x35   :  { %754 = vsyncadd [#allocation6], 4294965120 }
  0x36   :  { %755 = dma.done.wait [#allocation9], 2048  }
  0x37   :  { %756 = vsyncadd [#allocation9], 4294965248  ;;  %vm91_vm0 = vcmask 64512   ;;  %v83_v0 = vld [vmem:[#allocation5] sm:$0xff]  ;;  %v81_v1 = vld [vmem:[#allocation2] sm:$0xff]  ;;  %v769_v19 = vmov 0   ;;  %v194_v44 = vlaneseq }
  0x38   :  { %v82_v2 = vld [vmem:[#allocation2 + $0x8] sm:$0xff]  ;;  %594 = vmatprep.subr.mxu0 %v83_v0  ;;  %596 = vmatprep.mubr.msk.f32.mxu0 %vm91_vm0, %v81_v1  ;;  %v614_v5 = vld [vmem:[#allocation7 + $0x64] ss:$8 sps:$4 sm:$0xff]   ;;  %v616_v6 = vld [vmem:[#allocation7 + $0x60] ss:$8 sps:$4 sm:$0xff]   ;;  %vm511_vm1 = vcmask 31744  }
  0x39   :  { %v611_v3 = vld [vmem:[#allocation7 + $0x74] ss:$8 sps:$4 sm:$0xff]   ;;  %595 = vmatpush3.msra.mxu0 %v83_v0  ;;  %v613_v4 = vld [vmem:[#allocation7 + $0x70] ss:$8 sps:$4 sm:$0xff]   ;;  %v620_v9 = vld [vmem:[#allocation7 + $0x44] ss:$8 sps:$4 sm:$0xff]   ;;  %316 = vmatprep.mubr.bf16.mxu1 %v769_v19 }
  0x3a   :  { %597 = vmatmul.mubr.msk.f32.vlgmr.msra.gmra.mxu0 %vm91_vm0, %v82_v2  ;;  %284 = vmatprep.subr.bf16.mxu1 %v611_v3  ;;  %v617_v7 = vld [vmem:[#allocation7 + $0x54] ss:$8 sps:$4 sm:$0xff]   ;;  %v619_v8 = vld [vmem:[#allocation7 + $0x50] ss:$8 sps:$4 sm:$0xff]   ;;  %v622_v10 = vld [vmem:[#allocation7 + $0x40] ss:$8 sps:$4 sm:$0xff]  }
  0x3b   :  { %285 = vmatpush1.bf16.msra.mxu1 %v613_v4  ;;  %v623_v11 = vld [vmem:[#allocation7 + $0x34] ss:$8 sps:$4 sm:$0xff]   ;;  %v625_v12 = vld [vmem:[#allocation7 + $0x30] ss:$8 sps:$4 sm:$0xff]   ;;  %v626_v13 = vld [vmem:[#allocation7 + $0x24] ss:$8 sps:$4 sm:$0xff]  }
  0x3c   :  { %286 = vmatprep.subr.bf16.mxu1 %v614_v5  ;;  %v628_v14 = vld [vmem:[#allocation7 + $0x20] ss:$8 sps:$4 sm:$0xff]   ;;  %v629_v15 = vld [vmem:[#allocation7 + $0x14] ss:$8 sps:$4 sm:$0xff]   ;;  %v631_v16 = vld [vmem:[#allocation7 + $0x10] ss:$8 sps:$4 sm:$0xff]  }
  0x3d   :  { %v632_v17 = vld [vmem:[#allocation7 + $0x4] ss:$8 sps:$4 sm:$0xff]   ;;  %v634_v18 = vld [vmem:[#allocation7] ss:$8 sps:$4 sm:$0xff]   ;;  %v635_v20 = vld [vmem:[#allocation8 + $0x78] sm:$0xff]   ;;  %v195_v45 = vshrl.u32 %v194_v44, 7 }
  0x3e   :  { %v636_v21 = vld [vmem:[#allocation8 + $0x38] sm:$0xff]   ;;  %v637_v22 = vld [vmem:[#allocation8 + $0x70] sm:$0xff]   ;;  %572 = vmatprep.subr.bf16.mxu0 %v635_v20  ;;  %v639_v24 = vld [vmem:[#allocation8 + $0x68] sm:$0xff]  }
  0x3f   :  { %287 = vmatpush1.bf16.msra.mxu1 %v616_v6  ;;  %573 = vmatpush3.bf16.msra.mxu0 %v636_v21  ;;  %v638_v23 = vld [vmem:[#allocation8 + $0x30] sm:$0xff]   ;;  %v640_v25 = vld [vmem:[#allocation8 + $0x28] sm:$0xff]   ;;  %v641_v26 = vld [vmem:[#allocation8 + $0x60] sm:$0xff]   ;;  %v200_v46 = vsub.s32 1, %v195_v45  ;;  %v196_v47 = vsub.s32 0, %v195_v45 }
  0x40   :  { %288 = vmatprep.subr.bf16.mxu1 %v617_v7  ;;  %574 = vmatprep.subr.bf16.mxu0 %v637_v22  ;;  %v642_v27 = vld [vmem:[#allocation8 + $0x20] sm:$0xff]   ;;  %v643_v28 = vld [vmem:[#allocation8 + $0x58] sm:$0xff]   ;;  %v533_v30 = vld [vmem:[%s843_s2] ss:$0 sm:$0xff] }
  0x41   :  { %v644_v29 = vld [vmem:[#allocation8 + $0x18] sm:$0xff]   ;;  %v645_v38 = vld [vmem:[#allocation8 + $0x50] sm:$0xff]   ;;  %v647_v40 = vld [vmem:[#allocation8 + $0x48] sm:$0xff]  }
  0x42   :  { %v646_v39 = vld [vmem:[#allocation8 + $0x10] sm:$0xff]   ;;  %v648_v41 = vld [vmem:[#allocation8 + $0x8] sm:$0xff]   ;;  %v649_v42 = vld [vmem:[#allocation8 + $0x40] sm:$0xff]  }
  0x43   :  { %289 = vmatpush1.bf16.msra.mxu1 %v619_v8  ;;  %575 = vmatpush3.bf16.msra.mxu0 %v638_v23  ;;  %v650_v43 = vld [vmem:[#allocation8] sm:$0xff]   ;;  %v192_v48 = vld [vmem:[%s845_s4] sm:$0x3] }
  0x44   :  { %290 = vmatprep.subr.bf16.mxu1 %v620_v9  ;;  %576 = vmatprep.subr.bf16.mxu0 %v639_v24  ;;  %v201_v50 = vrot.slane %v192_v48, %v200_v46  ;;  %v197_v51 = vrot.slane %v192_v48, %v196_v47  ;;  %v568_v3 = vld [vmem:[%s847_s6] ss:$0 sm:$0xff] }
  0x47   :  { %291 = vmatpush1.bf16.msra.mxu1 %v622_v10  ;;  %577 = vmatpush3.bf16.msra.mxu0 %v640_v25 }
  0x48   :  { %292 = vmatprep.subr.bf16.mxu1 %v623_v11  ;;  %578 = vmatprep.subr.bf16.mxu0 %v641_v26 }
  0x4b   :  { %293 = vmatpush1.bf16.msra.mxu1 %v625_v12  ;;  %579 = vmatpush3.bf16.msra.mxu0 %v642_v27 }
  0x4c   :  { %294 = vmatprep.subr.bf16.mxu1 %v626_v13  ;;  %580 = vmatprep.subr.bf16.mxu0 %v643_v28 }
  0x4f   :  { %295 = vmatpush1.bf16.msra.mxu1 %v628_v14  ;;  %581 = vmatpush3.bf16.msra.mxu0 %v644_v29 }
  0x50   :  { %296 = vmatprep.subr.bf16.mxu1 %v629_v15  ;;  %582 = vmatprep.subr.bf16.mxu0 %v645_v38 }
  0x53   :  { %297 = vmatpush1.bf16.msra.mxu1 %v631_v16  ;;  %583 = vmatpush3.bf16.msra.mxu0 %v646_v39 }
  0x54   :  { %298 = vmatprep.subr.bf16.mxu1 %v632_v17  ;;  %584 = vmatprep.subr.bf16.mxu0 %v647_v40 }
  0x57   :  { %299 = vmatpush1.bf16.msra.mxu1 %v634_v18  ;;  %585 = vmatpush3.bf16.msra.mxu0 %v648_v41 }
  0x58   :  { %586 = vmatprep.subr.bf16.mxu0 %v649_v42 }
  0x5b   :  { %587 = vmatpush3.bf16.msra.mxu0 %v650_v43 }
  0xfa   :  { %v598_v31 = vpop.f32.mrf.mxu0 }
  0xfb   :  { %v170_v32 = vadd.f32 %v598_v31, %v533_v30 }
  0xfc   :  { %v164_v33 = vpop.f32.mrf.mxu0 }
  0xfd   :  { %v165_v34 = vadd.f32 %v533_v30, %v164_v33  ;;  %v174_v35 = vmax.f32 %v170_v32, 0.0 }
  0xff   :  { %v173_v36 = vmax.f32 %v165_v34, 0.0 }
 0x101   :  { %v175_v37 = vpack.c.bf16 %v174_v35, %v173_v36 }
 0x103   :  { %317 = vmatmul.mubr.bf16.vlgmr.msra.gmra.mxu1 %v175_v37 }
 0x1c3   :  { %v318_v49 = vpop.f32.mrf.mxu1 }
 0x1c4   :  { %v319_v56 = vadd.f32 %v318_v49, %v197_v51 }
 0x1c5   :  { %v320_v52 = vpop.f32.mrf.mxu1 }
 0x1c6   :  { %v321_v54 = vadd.f32 %v320_v52, %v201_v50  ;;  %v327_v62 = vmax.f32 %v319_v56, 0.0 }
 0x1c7   :  { %v322_v53 = vpop.f32.mrf.mxu1 }
 0x1c8   :  { %v323_v55 = vadd.f32 %v322_v53, %v197_v51  ;;  %v328_v60 = vmax.f32 %v321_v54, 0.0 }
 0x1c9   :  { %v324_v57 = vpop.f32.mrf.mxu1 }
 0x1ca   :  { %v325_v58 = vadd.f32 %v324_v57, %v201_v50  ;;  %v329_v59 = vmax.f32 %v323_v55, 0.0 }
 0x1cc   :  { %v330_v61 = vmax.f32 %v325_v58, 0.0  ;;  %v331_v0 = vpack.c.bf16 %v329_v59, %v327_v62 }
 0x1ce   :  { %v332_v63 = vpack.c.bf16 %v330_v61, %v328_v60 }
 0x1d0   :  { %493 = vmatprep.mubr.bf16.mxu0 %v332_v63 }
 0x1d1   :  { %494 = vmatmul.mubr.bf16.vlgmr.msra.gmra.mxu0 %v331_v0 }
 0x291   :  { %v588_v1 = vpop.f32.mrf.mxu0 }
 0x293   :  { %v589_v2 = vpop.f32.mrf.mxu0 }
 0x294   :  { %v590_v4 = vadd.f32 %v589_v2, %v588_v1 }
 0x295   :  { %v591_v5 = vpop.f32.mrf.mxu0 }
 0x296   :  { %v509_v6 = vadd.f32 %v590_v4, %v568_v3 }
 0x297   :  { %v592_v7 = vpop.f32.mrf.mxu0 }
 0x298   :  { %512 = vst.msk [vmem:[#allocation10] sm:$0xff] %vm511_vm1, %v509_v6  ;;  %v593_v8 = vadd.f32 %v592_v7, %v591_v5 }
 0x29a   :  { %v510_v9 = vadd.f32 %v593_v8, %v568_v3 }
 0x29c   :  { %513 = vst.msk [vmem:[#allocation10 + $0x8] sm:$0xff] %vm511_vm1, %v510_v9 }
 0x29d   :  { %518 = vsyncadd [#allocation4], 224  ;;  %s770_s28 = smov [#allocation10]  }
 0x29e   :  { %s519_s29 = sshll.u32 %s770_s28, 4  ;;  %s520_s29 = int_to_ptr.vmem [resolvable:$true] %s519_s29 }
 0x29f   :  { %s731_s30 = scalar_lea.vmem %s520_s29, 32  ;;  %s735_s8 = scalar_lea.vmem %s520_s29, 256 }
 0x2a0   :  { %p732_p6 = scmp.ne.s32.totalorder %s520_s29, %s731_s30  ;;  %p736_p7 = scmp.lt.s32.totalorder %s520_s29, %s520_s29 }
 0x2a1   :  { %p737_p8 = scmp.lt.s32.totalorder %s735_s8, %s731_s30 }
 0x2a3   :  { %p738_p9 = por %p737_p8, %p736_p7 }
 0x2a5   :  { %p739_p10 = pnand %p738_p9, %p732_p6 }
 0x2a7   :  { %742 = shalt.err (!%p739_p10)
}
 0x2a8   :  { %525 = dma.vmem_to_hbm [thread:$0]  %s520_s29, 32, %s848_s7, [#allocation4], %s761_s10, %s761_s10, %s762_s11  }
 0x2a9   :  { %757 = dma.done.wait [#allocation4], 256  }
 0x2aa   :  { %758 = vsyncadd [#allocation4], 4294967040 }
 0x2ab   :  { %529 = vsyncpa [#allocation3], 1 }
 0x2ac   :  { %530 = vsyncpa [#allocation6], 1 }
 0x2ad   :  { %531 = vsyncpa [#allocation9], 1 }
 0x2ae   :  { %532 = vsyncpa [#allocation4], 1 }

</bundles_post_ra>
